<compile_context>
chip_gen: v5e
topology: v5e:2x2
jax: 0.10.0
libtpu: 0.0.40
codegen_flags: <defaults>
</compile_context>

<pallas_src>
import functools

import jax
import jax.numpy as jnp
from jax.experimental import pallas as pl
from jax.experimental.pallas import tpu as pltpu

# ---- scaled-down config (module defaults: hidden=768, nb_answer=2000, num_roi=36) ----
HIDDEN = 128          # hidden_size (scaled down from 768)
NB_ANSWER = 256       # nb_answer   (scaled down from 2000)
NUM_ROI = 8           # num_roi     (scaled down from 36)
SEQ = 8               # text sequence length
NUM_SAMPLES = 4       # GaussianEncoder sampling=4
LN_EPS = 1e-5         # torch.nn.LayerNorm default eps
_INV_SQRT2 = 0.7071067811865476

_LANE = 128           # lane width
_ROW_ALIGN = 16       # bf16 sublane packing granularity for the row axis
_MAX_ROW_TILE = 256   # rows per grid step at large R (256-wide MXU, amortized step cost)
_SUB_ROWS = 64        # intra-body sub-tile rows (MXU/VPU overlap across sub-tiles)


def _round_up(n, m):
    return (n + m - 1) // m * m


def _ans_cls_kernel(x_ref, w1_ref, b1_ref, gamma_ref, beta_ref, w2_ref, b2_ref, o_ref,
                    *, sub_rows, n_sub):
    """Fused Linear -> exact GELU -> LayerNorm -> Linear on one row tile.

    The row tile is processed as `n_sub` statically-unrolled sub-tiles of `sub_rows` rows
    so the Mosaic scheduler can overlap sub-tile j+1's MXU matmuls with sub-tile j's
    VALU/EUP/XLU work (erf-GELU, LayerNorm reductions).
    """
    w1 = w1_ref[...]          # (F2, F2)  bf16, resident
    w2 = w2_ref[...]          # (F2, Apad) bf16, resident
    b1 = b1_ref[...]          # (1, F2)   f32
    gamma = gamma_ref[...]    # (1, F2)   f32
    beta = beta_ref[...]      # (1, F2)   f32
    b2 = b2_ref[...]          # (1, Apad) f32

    for j in range(n_sub):                     # static unroll -> one basic block
        r0 = j * sub_rows
        x = x_ref[r0:r0 + sub_rows, :]         # bf16 rows (cast done in wrapper)

        # Linear(2H -> 2H): bf16 operands, f32 MXU accumulation.
        h = jnp.dot(x, w1, preferred_element_type=jnp.float32) + b1

        # nn.GELU() default = exact erf-based GELU (f32).
        g = 0.5 * h * (1.0 + jax.lax.erf(h * _INV_SQRT2))

        # LayerNorm over the feature (lane) axis; single-pass variance.
        mu = jnp.mean(g, axis=-1, keepdims=True)
        var = jnp.mean(g * g, axis=-1, keepdims=True) - mu * mu
        ln = (g - mu) * jax.lax.rsqrt(var + LN_EPS) * gamma + beta

        # Linear(2H -> nb_answer): bf16 operands, f32 accumulation; lane-dense store.
        out = jnp.dot(ln.astype(jnp.bfloat16), w2, preferred_element_type=jnp.float32) + b2
        o_ref[r0:r0 + sub_rows, :] = out.astype(o_ref.dtype)


def prepare_ans_cls_params(w1, b1, gamma, beta, w2, b2):
    """One-time parameter prep, hoisted off the hot path.

    * W1/W2 stored as bf16 (halves HBM traffic / VMEM; accumulation stays f32 in-kernel).
    * W2/b2 lane-padded so the output store path is lane-dense (unmasked vst).
    Returns (prepped_params, nb_answer).
    """
    a = w2.shape[1]
    a_pad = _round_up(a, _LANE)
    if a_pad != a:
        w2 = jnp.pad(w2, ((0, 0), (0, a_pad - a)))
        b2 = jnp.pad(b2, ((0, 0), (0, a_pad - a)))
    prepped = (
        w1.astype(jnp.bfloat16),
        b1.astype(jnp.float32),
        gamma.astype(jnp.float32),
        beta.astype(jnp.float32),
        w2.astype(jnp.bfloat16),
        b2.astype(jnp.float32),
    )
    return prepped, a


@functools.partial(jax.jit, static_argnames=("nb_answer",))
def ans_cls_pallas(x, w1, b1, gamma, beta, w2, b2, *, nb_answer):
    """x: (R, 2H) bf16 -> (R, nb_answer) f32.  Weights pre-prepped (bf16, lane-padded)."""
    r, f2 = x.shape
    a_pad = w2.shape[1]

    # Row tiling: single block when small (weight-DMA-bound; don't split), 256-row tiles
    # when large (>=2 "parallel" grid steps => both v7x TensorCores get work).
    r_pad = _round_up(r, _ROW_ALIGN)
    if r_pad <= _MAX_ROW_TILE:
        row_tile = r_pad
    else:
        row_tile = _MAX_ROW_TILE
        r_pad = _round_up(r, row_tile)
    if r_pad != r:
        x = jnp.pad(x, ((0, r_pad - r), (0, 0)))

    # Intra-body sub-tiling (only when it divides the row tile cleanly).
    if row_tile > _SUB_ROWS and row_tile % _SUB_ROWS == 0:
        sub_rows = _SUB_ROWS
    else:
        sub_rows = row_tile
    n_sub = row_tile // sub_rows

    kernel = functools.partial(_ans_cls_kernel, sub_rows=sub_rows, n_sub=n_sub)
    const = pl.Buffered(1)  # grid-invariant weights/biases: no pointless double-buffering

    out = pl.pallas_call(
        kernel,
        out_shape=jax.ShapeDtypeStruct((r_pad, a_pad), jnp.float32),
        grid_spec=pl.GridSpec(
            grid=(r_pad // row_tile,),
            in_specs=[
                pl.BlockSpec((row_tile, f2), lambda i: (i, 0)),                    # x rows (bf16)
                pl.BlockSpec((f2, f2), lambda i: (0, 0), pipeline_mode=const),     # W1 (bf16)
                pl.BlockSpec((1, f2), lambda i: (0, 0), pipeline_mode=const),      # b1
                pl.BlockSpec((1, f2), lambda i: (0, 0), pipeline_mode=const),      # LN gamma
                pl.BlockSpec((1, f2), lambda i: (0, 0), pipeline_mode=const),      # LN beta
                pl.BlockSpec((f2, a_pad), lambda i: (0, 0), pipeline_mode=const),  # W2 (bf16)
                pl.BlockSpec((1, a_pad), lambda i: (0, 0), pipeline_mode=const),   # b2
            ],
            out_specs=pl.BlockSpec((row_tile, a_pad), lambda i: (i, 0)),
        ),
        compiler_params=pltpu.CompilerParams(
            dimension_semantics=("parallel",),
            vmem_limit_bytes=32 * 1024 * 1024,   # safe on v7x (64 MiB phys); ~17 MiB real
        ),
    )(x, w1, b1, gamma, beta, w2, b2)
    return out[:r, :nb_answer]


def vcin_forward_eval(img, box, text_input, token_type, attention_mask,
                      prepped_params, nb_answer, key):
    """Eval-mode VCIN.forward (explainable=True path)."""
    b = img.shape[0]

    # visual / concat masks (trivial glue, exact semantics of the torch code)
    visual_mask = jnp.ones((b, NUM_ROI), jnp.float32)
    concat_mask = jnp.concatenate([attention_mask.astype(jnp.float32), visual_mask], axis=1)
    del concat_mask  # only consumed by the (untranslated) exp_generator

    # TODO(synk): LXRTEncoder (bert_encoder), ExpGenerator and GaussianEncoder
    # (exp_var_feature) have no definitions in the provided source; their outputs
    # (cls_feat pooled output and the q_val variational samples) are produced as
    # deterministic synthetic features instead of faking those submodules.
    k1, k2 = jax.random.split(key)
    cls_feat = jax.random.normal(k1, (b, HIDDEN), jnp.float32)            # pooled_output
    q_val = jax.random.normal(k2, (b, NUM_SAMPLES, HIDDEN), jnp.float32)  # q samples
    pred_pro = None  # from exp_generator (untranslated)

    # ans_feat = cat(cls_feat.unsqueeze(1).expand(-1, S, -1), q_val, dim=-1)
    # Emitted directly in bf16: halves the row-proportional HBM->VMEM traffic and removes
    # the in-kernel f32->bf16 cast from the VALU slot.
    ans_feat = jnp.concatenate(
        [jnp.broadcast_to(cls_feat[:, None, :], (b, NUM_SAMPLES, HIDDEN)), q_val], axis=-1
    ).astype(jnp.bfloat16)
    x = ans_feat.reshape(b * NUM_SAMPLES, 2 * HIDDEN)

    out = ans_cls_pallas(x, *prepped_params, nb_answer=nb_answer)
    out = out.reshape(b, NUM_SAMPLES, nb_answer)

    # output_ans_final.squeeze(1): no-op here since NUM_SAMPLES > 1 (matches torch squeeze)
    output_ans_final = out if out.shape[1] != 1 else out[:, 0]
    return output_ans_final, pred_pro, x  # x returned only for the reference check


def _reference_head_f32(x, w1, b1, gamma, beta, w2, b2):
    """Pure-f32 reference of the torch ans_cls head (no bf16 mirroring)."""
    h = jnp.dot(x, w1) + b1
    g = 0.5 * h * (1.0 + jax.lax.erf(h * _INV_SQRT2))
    mu = g.mean(-1, keepdims=True)
    var = jnp.square(g - mu).mean(-1, keepdims=True)
    ln = (g - mu) * jax.lax.rsqrt(var + LN_EPS) * gamma + beta
    return jnp.dot(ln, w2) + b2


if __name__ == "__main__":
    key = jax.random.PRNGKey(0)
    ks = jax.random.split(key, 10)
    B = 2
    F2 = 2 * HIDDEN

    # nominal VCIN inputs (small shapes)
    img = jax.random.normal(ks[0], (B, NUM_ROI, 64), jnp.float32)     # visual features
    box = jax.random.uniform(ks[1], (B, NUM_ROI, 4), jnp.float32)     # box coords
    text_input = jax.random.randint(ks[2], (B, SEQ), 0, 100, jnp.int32)
    token_type = jnp.zeros((B, SEQ), jnp.int32)
    attention_mask = jnp.ones((B, SEQ), jnp.int32)

    # deterministic ans_cls parameters (explainable path: Linear(2H,2H), LN(2H), Linear(2H,A))
    scale = 0.02
    w1 = scale * jax.random.normal(ks[3], (F2, F2), jnp.float32)
    b1 = scale * jax.random.normal(ks[4], (1, F2), jnp.float32)
    gamma = jnp.ones((1, F2), jnp.float32)
    beta = jnp.zeros((1, F2), jnp.float32)
    w2 = scale * jax.random.normal(ks[5], (F2, NB_ANSWER), jnp.float32)
    b2 = scale * jax.random.normal(ks[6], (1, NB_ANSWER), jnp.float32)
    raw_params = (w1, b1, gamma, beta, w2, b2)

    # One-time weight prep (off the hot path).
    prepped_params, nb_answer = prepare_ans_cls_params(*raw_params)

    output_ans_final, pred_pro, x_rows = vcin_forward_eval(
        img, box, text_input, token_type, attention_mask, prepped_params, nb_answer, ks[7]
    )
    jax.block_until_ready(output_ans_final)

    # Validate against a pure-f32 reference head (tolerance sized for bf16 matmul operands).
    expected = _reference_head_f32(x_rows.astype(jnp.float32), *raw_params)
    expected = expected.reshape(B, NUM_SAMPLES, NB_ANSWER)
    assert output_ans_final.shape == (B, NUM_SAMPLES, NB_ANSWER)
    assert jnp.allclose(output_ans_final, expected, atol=3e-2, rtol=3e-2)

    print("KERNEL_OK")
</pallas_src>

<mosaic_0001>
module attributes {stable_mosaic.version = 11 : i64} {
  func.func @_ans_cls_kernel(%arg0: i32, %arg1: memref<16x256xbf16, #tpu.memory_space<vmem>>, %arg2: memref<256x256xbf16, #tpu.memory_space<vmem>>, %arg3: memref<1x256xf32, #tpu.memory_space<vmem>>, %arg4: memref<1x256xf32, #tpu.memory_space<vmem>>, %arg5: memref<1x256xf32, #tpu.memory_space<vmem>>, %arg6: memref<256x256xbf16, #tpu.memory_space<vmem>>, %arg7: memref<1x256xf32, #tpu.memory_space<vmem>>, %arg8: memref<16x256xf32, #tpu.memory_space<vmem>>) attributes {dimension_semantics = [#tpu.dimension_semantics<parallel>], iteration_bounds = array<i64: 1>, scalar_prefetch = 0 : i64, scratch_operands = 0 : i64, tpu.core_type = #tpu.core_type<tc>, window_params = [{transform_indices = @transform_0, window_bounds = array<i64: 16, 256>}, {pipeline_mode = #tpu.pipeline_mode<synchronous>, transform_indices = @transform_1, window_bounds = array<i64: 256, 256>}, {pipeline_mode = #tpu.pipeline_mode<synchronous>, transform_indices = @transform_2, window_bounds = array<i64: 1, 256>}, {pipeline_mode = #tpu.pipeline_mode<synchronous>, transform_indices = @transform_3, window_bounds = array<i64: 1, 256>}, {pipeline_mode = #tpu.pipeline_mode<synchronous>, transform_indices = @transform_4, window_bounds = array<i64: 1, 256>}, {pipeline_mode = #tpu.pipeline_mode<synchronous>, transform_indices = @transform_5, window_bounds = array<i64: 256, 256>}, {pipeline_mode = #tpu.pipeline_mode<synchronous>, transform_indices = @transform_6, window_bounds = array<i64: 1, 256>}, {transform_indices = @transform_7, window_bounds = array<i64: 16, 256>}]} {
    %c0 = arith.constant 0 : index
    %c0_0 = arith.constant 0 : index
    %0 = vector.load %arg2[%c0, %c0_0] : memref<256x256xbf16, #tpu.memory_space<vmem>>, vector<256x256xbf16>
    %c0_1 = arith.constant 0 : index
    %c0_2 = arith.constant 0 : index
    %1 = vector.load %arg6[%c0_1, %c0_2] : memref<256x256xbf16, #tpu.memory_space<vmem>>, vector<256x256xbf16>
    %c0_3 = arith.constant 0 : index
    %c0_4 = arith.constant 0 : index
    %2 = vector.load %arg3[%c0_3, %c0_4] : memref<1x256xf32, #tpu.memory_space<vmem>>, vector<1x256xf32>
    %c0_5 = arith.constant 0 : index
    %c0_6 = arith.constant 0 : index
    %3 = vector.load %arg4[%c0_5, %c0_6] : memref<1x256xf32, #tpu.memory_space<vmem>>, vector<1x256xf32>
    %c0_7 = arith.constant 0 : index
    %c0_8 = arith.constant 0 : index
    %4 = vector.load %arg5[%c0_7, %c0_8] : memref<1x256xf32, #tpu.memory_space<vmem>>, vector<1x256xf32>
    %c0_9 = arith.constant 0 : index
    %c0_10 = arith.constant 0 : index
    %5 = vector.load %arg7[%c0_9, %c0_10] : memref<1x256xf32, #tpu.memory_space<vmem>>, vector<1x256xf32>
    %c0_11 = arith.constant 0 : index
    %c0_12 = arith.constant 0 : index
    %6 = vector.load %arg1[%c0_11, %c0_12] : memref<16x256xbf16, #tpu.memory_space<vmem>>, vector<16x256xbf16>
    %cst = arith.constant dense<0.000000e+00> : vector<16x256xf32>
    %7 = tpu.matmul %6, %0, %cst {dimension_numbers = #tpu.dot_dimension_numbers<[1], [0], [0], [1], [0, 0, 1, 1], [], []>} : vector<16x256xbf16>, vector<256x256xbf16>, vector<16x256xf32> -> vector<16x256xf32>
    %8 = vector.broadcast %2 : vector<1x256xf32> to vector<16x256xf32>
    %9 = arith.addf %7, %8 : vector<16x256xf32>
    %cst_13 = arith.constant 5.000000e-01 : f32
    %10 = vector.broadcast %cst_13 : f32 to vector<16x256xf32>
    %11 = arith.mulf %10, %9 : vector<16x256xf32>
    %cst_14 = arith.constant 0.707106769 : f32
    %12 = vector.broadcast %cst_14 : f32 to vector<16x256xf32>
    %13 = arith.mulf %9, %12 : vector<16x256xf32>
    %14 = math.erf %13 : vector<16x256xf32>
    %cst_15 = arith.constant 1.000000e+00 : f32
    %15 = vector.broadcast %cst_15 : f32 to vector<16x256xf32>
    %16 = arith.addf %15, %14 : vector<16x256xf32>
    %17 = arith.mulf %11, %16 : vector<16x256xf32>
    %cst_16 = arith.constant dense<0.000000e+00> : vector<16xf32>
    %18 = vector.multi_reduction <add>, %17, %cst_16 [1] : vector<16x256xf32> to vector<16xf32>
    %19 = vector.shape_cast %18 : vector<16xf32> to vector<16x1xf32>
    %cst_17 = arith.constant 2.560000e+02 : f32
    %20 = vector.broadcast %cst_17 : f32 to vector<16x1xf32>
    %21 = arith.divf %19, %20 : vector<16x1xf32>
    %22 = arith.mulf %17, %17 : vector<16x256xf32>
    %cst_18 = arith.constant dense<0.000000e+00> : vector<16xf32>
    %23 = vector.multi_reduction <add>, %22, %cst_18 [1] : vector<16x256xf32> to vector<16xf32>
    %24 = vector.shape_cast %23 : vector<16xf32> to vector<16x1xf32>
    %cst_19 = arith.constant 2.560000e+02 : f32
    %25 = vector.broadcast %cst_19 : f32 to vector<16x1xf32>
    %26 = arith.divf %24, %25 : vector<16x1xf32>
    %27 = arith.mulf %21, %21 : vector<16x1xf32>
    %28 = arith.subf %26, %27 : vector<16x1xf32>
    %29 = vector.broadcast %21 : vector<16x1xf32> to vector<16x256xf32>
    %30 = arith.subf %17, %29 : vector<16x256xf32>
    %cst_20 = arith.constant 9.99999974E-6 : f32
    %31 = vector.broadcast %cst_20 : f32 to vector<16x1xf32>
    %32 = arith.addf %28, %31 : vector<16x1xf32>
    %33 = math.rsqrt %32 : vector<16x1xf32>
    %34 = vector.broadcast %33 : vector<16x1xf32> to vector<16x256xf32>
    %35 = arith.mulf %30, %34 : vector<16x256xf32>
    %36 = vector.broadcast %3 : vector<1x256xf32> to vector<16x256xf32>
    %37 = arith.mulf %35, %36 : vector<16x256xf32>
    %38 = vector.broadcast %4 : vector<1x256xf32> to vector<16x256xf32>
    %39 = arith.addf %37, %38 : vector<16x256xf32>
    %40 = arith.truncf %39 : vector<16x256xf32> to vector<16x256xbf16>
    %cst_21 = arith.constant dense<0.000000e+00> : vector<16x256xf32>
    %41 = tpu.matmul %40, %1, %cst_21 {dimension_numbers = #tpu.dot_dimension_numbers<[1], [0], [0], [1], [0, 0, 1, 1], [], []>} : vector<16x256xbf16>, vector<256x256xbf16>, vector<16x256xf32> -> vector<16x256xf32>
    %42 = vector.broadcast %5 : vector<1x256xf32> to vector<16x256xf32>
    %43 = arith.addf %41, %42 : vector<16x256xf32>
    %c0_22 = arith.constant 0 : index
    %c0_23 = arith.constant 0 : index
    %44 = vector.load %arg8[%c0_22, %c0_23] : memref<16x256xf32, #tpu.memory_space<vmem>>, vector<16x256xf32>
    tpu.vector_store %arg8[%c0_22, %c0_23], %43 {strides = array<i32>} : memref<16x256xf32, #tpu.memory_space<vmem>>, vector<16x256xf32>,
    return
  }
  func.func @transform_0(%arg0: i32) -> (i32, i32) {
    %c0_i32 = arith.constant 0 : i32
    %c0_i32_0 = arith.constant 0 : i32
    return %arg0, %c0_i32 : i32, i32
  }
  func.func @transform_1(%arg0: i32) -> (i32, i32) {
    %c0_i32 = arith.constant 0 : i32
    %c0_i32_0 = arith.constant 0 : i32
    %c0_i32_1 = arith.constant 0 : i32
    return %c0_i32, %c0_i32_0 : i32, i32
  }
  func.func @transform_2(%arg0: i32) -> (i32, i32) {
    %c0_i32 = arith.constant 0 : i32
    %c0_i32_0 = arith.constant 0 : i32
    %c0_i32_1 = arith.constant 0 : i32
    return %c0_i32, %c0_i32_0 : i32, i32
  }
  func.func @transform_3(%arg0: i32) -> (i32, i32) {
    %c0_i32 = arith.constant 0 : i32
    %c0_i32_0 = arith.constant 0 : i32
    %c0_i32_1 = arith.constant 0 : i32
    return %c0_i32, %c0_i32_0 : i32, i32
  }
  func.func @transform_4(%arg0: i32) -> (i32, i32) {
    %c0_i32 = arith.constant 0 : i32
    %c0_i32_0 = arith.constant 0 : i32
    %c0_i32_1 = arith.constant 0 : i32
    return %c0_i32, %c0_i32_0 : i32, i32
  }
  func.func @transform_5(%arg0: i32) -> (i32, i32) {
    %c0_i32 = arith.constant 0 : i32
    %c0_i32_0 = arith.constant 0 : i32
    %c0_i32_1 = arith.constant 0 : i32
    return %c0_i32, %c0_i32_0 : i32, i32
  }
  func.func @transform_6(%arg0: i32) -> (i32, i32) {
    %c0_i32 = arith.constant 0 : i32
    %c0_i32_0 = arith.constant 0 : i32
    %c0_i32_1 = arith.constant 0 : i32
    return %c0_i32, %c0_i32_0 : i32, i32
  }
  func.func @transform_7(%arg0: i32) -> (i32, i32) {
    %c0_i32 = arith.constant 0 : i32
    %c0_i32_0 = arith.constant 0 : i32
    return %arg0, %c0_i32 : i32, i32
  }
}

</mosaic_0001>

<bundles_post_ra>
// kernel: ans_cls_pallas.1
= control target key start
LH: loop header
LB: loop body
LE: loop exit
PB: predicated region body
PF: predicated region fallthrough
CT: control target
= control target key end

     0   :  { %12 = vsyncpa [#allocation3], 0  ;;  %s1471_s0 = inlined_call_operand.vmem [shape: bf16[16,256], index: 0, kind: input, shape index: {}]   ;;  %s1472_s1 = inlined_call_operand.hbm [shape: bf16[256,256], index: 1, kind: input, shape index: {}]   ;;  %s1473_s2 = inlined_call_operand.vmem [shape: f32[1,256], index: 2, kind: input, shape index: {}]   ;;  %s1474_s3 = inlined_call_operand.vmem [shape: f32[1,256], index: 3, kind: input, shape index: {}]   ;;  %s1475_s4 = inlined_call_operand.vmem [shape: f32[1,256], index: 4, kind: input, shape index: {}]   ;;  %s1476_s5 = inlined_call_operand.hbm [shape: bf16[256,256], index: 5, kind: input, shape index: {}]   ;;  %s1477_s6 = inlined_call_operand.vmem [shape: f32[1,256], index: 6, kind: input, shape index: {}]   ;;  %s1478_s7 = inlined_call_operand.vmem [shape: f32[16,256], index: 7, kind: output, shape index: {}]  }
   0x1   :  { %s20_s26 = sshll.u32 %s1472_s1, 4  ;;  %s21_s26 = int_to_ptr.hbm [resolvable:$true] %s20_s26 }
   0x2   :  { %13 = vsyncpa [#allocation5], 0  ;;  %s1252_s27 = smov [#allocation2]   ;;  %s39_s8 = sshll.u32 %s1476_s5, 4  ;;  %s40_s8 = int_to_ptr.hbm [resolvable:$true] %s39_s8 }
   0x3   :  { %s22_s28 = sshll.u32 %s1252_s27, 4  ;;  %s1253_s9 = smov 128   ;;  %s23_s28 = int_to_ptr.vmem [resolvable:$true] %s22_s28 }
   0x4   :  { %s1254_s10 = smov 8   ;;  %s1255_s11 = smov [#allocation4]  }
   0x5   :  { %28 = dma.hbm_to_vmem [thread:$0]  %s21_s26, 4096, %s23_s28, [#allocation3], %s1253_s9, %s1253_s9, %s1254_s10  }
   0x6   :  { %s41_s12 = sshll.u32 %s1255_s11, 4  ;;  %s42_s12 = int_to_ptr.vmem [resolvable:$true] %s41_s12 }
   0x7   :  { %47 = dma.hbm_to_vmem [thread:$0]  %s40_s8, 4096, %s42_s12, [#allocation5], %s1253_s9, %s1253_s9, %s1254_s10  }
   0x8   :  { %1248 = dma.done.wait [#allocation3], 4096  }
   0x9   :  { %1249 = vsyncadd [#allocation3], 4294963200 }
   0xa   :  { %1250 = dma.done.wait [#allocation5], 4096  }
   0xb   :  { %1251 = vsyncadd [#allocation5], 4294963200  ;;  %v913_v0 = vld [vmem:[#allocation2 + $0x70] sm:$0xf]  ;;  %v1130_v1 = vld [vmem:[#allocation2 + $0x74] sm:$0xf0] }
   0xc   :  { %v977_v2 = vld [vmem:[#allocation2 + $0xf0] sm:$0xf]  ;;  %v914_v3 = vor.u32 %v1130_v1, %v913_v0  ;;  %v1146_v4 = vld [vmem:[#allocation2 + $0xf4] sm:$0xf0]  ;;  %v1129_v5 = vld [vmem:[#allocation2 + $0x74] sm:$0xf] }
   0xd   :  { %v915_v6 = vld [vmem:[#allocation2 + $0x78] sm:$0xf0]  ;;  %v978_v7 = vor.u32 %v1146_v4, %v977_v2  ;;  %v1145_v9 = vld [vmem:[#allocation2 + $0xf4] sm:$0xf]  ;;  %v905_v11 = vld [vmem:[#allocation2 + $0x60] sm:$0xf] }
   0xe   :  { %v918_v8 = vor.u32 %v1129_v5, %v915_v6  ;;  %v979_v10 = vld [vmem:[#allocation2 + $0xf8] sm:$0xf0]  ;;  %303 = vmatpush.bf16.msra.mxu0 %v914_v3  ;;  %v1128_v13 = vld [vmem:[#allocation2 + $0x64] sm:$0xf0]  ;;  %v969_v14 = vld [vmem:[#allocation2 + $0xe0] sm:$0xf] }
   0xf   :  { %v982_v12 = vor.u32 %v1145_v9, %v979_v10  ;;  %v1144_v15 = vld [vmem:[#allocation2 + $0xe4] sm:$0xf0]  ;;  %317 = vmatpush.bf16.msra.mxu1 %v978_v7  ;;  %v906_v16 = vor.u32 %v1128_v13, %v905_v11  ;;  %v1127_v18 = vld [vmem:[#allocation2 + $0x64] sm:$0xf]  ;;  %v907_v19 = vld [vmem:[#allocation2 + $0x68] sm:$0xf0] }
  0x10   :  { %331 = vmatpush.bf16.msra.mxu2 %v918_v8  ;;  %v970_v17 = vor.u32 %v1144_v15, %v969_v14  ;;  %v1143_v20 = vld [vmem:[#allocation2 + $0xe4] sm:$0xf]  ;;  %v910_v21 = vor.u32 %v1127_v18, %v907_v19  ;;  %v971_v22 = vld [vmem:[#allocation2 + $0xe8] sm:$0xf0]  ;;  %v897_v23 = vld [vmem:[#allocation2 + $0x50] sm:$0xf] }
  0x11   :  { %345 = vmatpush.bf16.msra.mxu3 %v982_v12  ;;  %v1126_v24 = vld [vmem:[#allocation2 + $0x54] sm:$0xf0]  ;;  %v974_v25 = vor.u32 %v1143_v20, %v971_v22  ;;  %v961_v26 = vld [vmem:[#allocation2 + $0xd0] sm:$0xf]  ;;  %v1125_v28 = vld [vmem:[#allocation2 + $0x54] sm:$0xf] }
  0x12   :  { %v1142_v27 = vld [vmem:[#allocation2 + $0xd4] sm:$0xf0]  ;;  %304 = vmatpush.bf16.msra.mxu0 %v906_v16  ;;  %v898_v29 = vor.u32 %v1126_v24, %v897_v23  ;;  %v899_v30 = vld [vmem:[#allocation2 + $0x58] sm:$0xf0]  ;;  %v1141_v31 = vld [vmem:[#allocation2 + $0xd4] sm:$0xf] }
  0x13   :  { %v963_v32 = vld [vmem:[#allocation2 + $0xd8] sm:$0xf0]  ;;  %318 = vmatpush.bf16.msra.mxu1 %v970_v17  ;;  %v962_v33 = vor.u32 %v1142_v27, %v961_v26  ;;  %v902_v34 = vor.u32 %v1125_v28, %v899_v30  ;;  %v889_v35 = vld [vmem:[#allocation2 + $0x40] sm:$0xf]  ;;  %v1124_v36 = vld [vmem:[#allocation2 + $0x44] sm:$0xf0] }
  0x14   :  { %332 = vmatpush.bf16.msra.mxu2 %v910_v21  ;;  %v953_v37 = vld [vmem:[#allocation2 + $0xc0] sm:$0xf]  ;;  %v966_v38 = vor.u32 %v1141_v31, %v963_v32  ;;  %v1140_v39 = vld [vmem:[#allocation2 + $0xc4] sm:$0xf0]  ;;  %v1123_v40 = vld [vmem:[#allocation2 + $0x44] sm:$0xf]  ;;  %v890_v44 = vor.u32 %v1124_v36, %v889_v35 }
  0x15   :  { %346 = vmatpush.bf16.msra.mxu3 %v974_v25  ;;  %v891_v41 = vld [vmem:[#allocation2 + $0x48] sm:$0xf0]  ;;  %v1139_v42 = vld [vmem:[#allocation2 + $0xc4] sm:$0xf]  ;;  %v954_v45 = vor.u32 %v1140_v39, %v953_v37  ;;  %v881_v47 = vld [vmem:[#allocation2 + $0x30] sm:$0xf] }
  0x16   :  { %v955_v43 = vld [vmem:[#allocation2 + $0xc8] sm:$0xf0]  ;;  %305 = vmatpush.bf16.msra.mxu0 %v898_v29  ;;  %v894_v46 = vor.u32 %v1123_v40, %v891_v41  ;;  %v1122_v48 = vld [vmem:[#allocation2 + $0x34] sm:$0xf0]  ;;  %v945_v49 = vld [vmem:[#allocation2 + $0xb0] sm:$0xf] }
  0x17   :  { %319 = vmatpush.bf16.msra.mxu1 %v962_v33  ;;  %v958_v50 = vor.u32 %v1139_v42, %v955_v43  ;;  %v1138_v51 = vld [vmem:[#allocation2 + $0xb4] sm:$0xf0]  ;;  %v1121_v52 = vld [vmem:[#allocation2 + $0x34] sm:$0xf]  ;;  %v883_v53 = vld [vmem:[#allocation2 + $0x38] sm:$0xf0]  ;;  %v882_v56 = vor.u32 %v1122_v48, %v881_v47 }
  0x18   :  { %333 = vmatpush.bf16.msra.mxu2 %v902_v34  ;;  %v1137_v54 = vld [vmem:[#allocation2 + $0xb4] sm:$0xf]  ;;  %v947_v55 = vld [vmem:[#allocation2 + $0xb8] sm:$0xf0]  ;;  %v946_v57 = vor.u32 %v1138_v51, %v945_v49  ;;  %v886_v58 = vor.u32 %v1121_v52, %v883_v53  ;;  %v873_v59 = vld [vmem:[#allocation2 + $0x20] sm:$0xf] }
  0x19   :  { %347 = vmatpush.bf16.msra.mxu3 %v966_v38  ;;  %v1120_v60 = vld [vmem:[#allocation2 + $0x24] sm:$0xf0]  ;;  %v937_v61 = vld [vmem:[#allocation2 + $0xa0] sm:$0xf]  ;;  %v950_v62 = vor.u32 %v1137_v54, %v947_v55  ;;  %v1119_v0 = vld [vmem:[#allocation2 + $0x24] sm:$0xf] }
  0x1a   :  { %306 = vmatpush.bf16.msra.mxu0 %v890_v44  ;;  %v1136_v63 = vld [vmem:[#allocation2 + $0xa4] sm:$0xf0]  ;;  %v875_v1 = vld [vmem:[#allocation2 + $0x28] sm:$0xf0]  ;;  %v1135_v2 = vld [vmem:[#allocation2 + $0xa4] sm:$0xf]  ;;  %v874_v4 = vor.u32 %v1120_v60, %v873_v59 }
  0x1b   :  { %320 = vmatpush.bf16.msra.mxu1 %v954_v45  ;;  %v939_v3 = vld [vmem:[#allocation2 + $0xa8] sm:$0xf0]  ;;  %v938_v5 = vor.u32 %v1136_v63, %v937_v61  ;;  %v878_v6 = vor.u32 %v1119_v0, %v875_v1  ;;  %v865_v7 = vld [vmem:[#allocation2 + $0x10] sm:$0xf]  ;;  %v1118_v8 = vld [vmem:[#allocation2 + $0x14] sm:$0xf0] }
  0x1c   :  { %334 = vmatpush.bf16.msra.mxu2 %v894_v46  ;;  %v929_v9 = vld [vmem:[#allocation2 + $0x90] sm:$0xf]  ;;  %v942_v10 = vor.u32 %v1135_v2, %v939_v3  ;;  %v1134_v11 = vld [vmem:[#allocation2 + $0x94] sm:$0xf0]  ;;  %v1117_v12 = vld [vmem:[#allocation2 + $0x14] sm:$0xf]  ;;  %v866_v16 = vor.u32 %v1118_v8, %v865_v7 }
  0x1d   :  { %348 = vmatpush.bf16.msra.mxu3 %v958_v50  ;;  %v867_v13 = vld [vmem:[#allocation2 + $0x18] sm:$0xf0]  ;;  %v1133_v14 = vld [vmem:[#allocation2 + $0x94] sm:$0xf]  ;;  %v930_v17 = vor.u32 %v1134_v11, %v929_v9  ;;  %v857_v19 = vld [vmem:[#allocation2] sm:$0xf] }
  0x1e   :  { %307 = vmatpush.bf16.msra.mxu0 %v882_v56  ;;  %v931_v15 = vld [vmem:[#allocation2 + $0x98] sm:$0xf0]  ;;  %v870_v18 = vor.u32 %v1117_v12, %v867_v13  ;;  %v1116_v20 = vld [vmem:[#allocation2 + $0x4] sm:$0xf0]  ;;  %v921_v21 = vld [vmem:[#allocation2 + $0x80] sm:$0xf] }
  0x1f   :  { %321 = vmatpush.bf16.msra.mxu1 %v946_v57  ;;  %v934_v22 = vor.u32 %v1133_v14, %v931_v15  ;;  %v1132_v23 = vld [vmem:[#allocation2 + $0x84] sm:$0xf0]  ;;  %v1115_v24 = vld [vmem:[#allocation2 + $0x4] sm:$0xf]  ;;  %v859_v25 = vld [vmem:[#allocation2 + $0x8] sm:$0xf0]  ;;  %v858_v28 = vor.u32 %v1116_v20, %v857_v19 }
  0x20   :  { %335 = vmatpush.bf16.msra.mxu2 %v886_v58  ;;  %v1131_v26 = vld [vmem:[#allocation2 + $0x84] sm:$0xf]  ;;  %v923_v27 = vld [vmem:[#allocation2 + $0x88] sm:$0xf0]  ;;  %v849_v29 = vld [vmem:[%s1471_s0] sm:$0xf]  ;;  %v922_v31 = vor.u32 %v1132_v23, %v921_v21  ;;  %v862_v32 = vor.u32 %v1115_v24, %v859_v25 }
  0x21   :  { %349 = vmatpush.bf16.msra.mxu3 %v950_v62  ;;  %v1180_v30 = vld [vmem:[%s1471_s0 + $0x4] sm:$0xf0]  ;;  %v1179_v33 = vld [vmem:[%s1471_s0 + $0x4] sm:$0xf]  ;;  %v851_v34 = vld [vmem:[%s1471_s0 + $0x8] sm:$0xf0]  ;;  %v926_v35 = vor.u32 %v1131_v26, %v923_v27 }
  0x22   :  { %308 = vmatpush.bf16.msra.mxu0 %v874_v4  ;;  %v850_v36 = vor.u32 %v1180_v30, %v849_v29  ;;  %v854_v37 = vor.u32 %v1179_v33, %v851_v34  ;;  %v122_v38 = vld [vmem:[%s1473_s2] sm:$0x3] }
  0x23   :  { %322 = vmatpush.bf16.msra.mxu1 %v938_v5  ;;  %v129_v39 = vperm.slane %v122_v38, 0  ;;  %v130_v44 = vperm.slane %v122_v38, 1 }
  0x24   :  { %336 = vmatpush.bf16.msra.mxu2 %v878_v6 }
  0x25   :  { %350 = vmatpush.bf16.msra.mxu3 %v942_v10 }
  0x26   :  { %309 = vmatpush.bf16.msra.mxu0 %v866_v16 }
  0x27   :  { %323 = vmatpush.bf16.msra.mxu1 %v930_v17 }
  0x28   :  { %337 = vmatpush.bf16.msra.mxu2 %v870_v18 }
  0x29   :  { %351 = vmatpush.bf16.msra.mxu3 %v934_v22 }
  0x2a   :  { %310 = vmatpush.bf16.msra.mxu0 %v858_v28 }
  0x2b   :  { %324 = vmatpush.bf16.msra.mxu1 %v922_v31 }
  0x2c   :  { %338 = vmatpush.bf16.msra.mxu2 %v862_v32 }
  0x2d   :  { %352 = vmatpush.bf16.msra.mxu3 %v926_v35  ;;  %311 = vmatmul.bf16.vlgmr.msra.gmra.mxu0 %v850_v36 }
  0x2e   :  { %325 = vmatmul.bf16.vlgmr.msra.gmra.mxu1 %v854_v37 }
  0x2f   :  { %339 = vmatmul.bf16.vlgmr.msra.gmra.mxu2 %v850_v36 }
  0x30   :  { %353 = vmatmul.bf16.vlgmr.msra.gmra.mxu3 %v854_v37 }
  0xaa   :  { %v312_v40 = vpop.f32.mrf.mxu0 }
  0xab   :  { %v313_v41 = vadd.f32 %v312_v40, %v129_v39  ;;  %v326_v42 = vpop.f32.mrf.mxu1 }
  0xad   :  { %v1318_v43 = vadd.f32 %v326_v42, %v313_v41 }
  0xaf   :  { %v1321_v45 = vmul.f32 0.70710677, %v1318_v43 }
  0xb1   :  { %v367_v46 = vmul.f32 %v1321_v45, %v1321_v45 }
  0xb2   :  { %v340_v47 = vpop.f32.mrf.mxu2  ;;  %v314_v50 = vpop.f32.mrf.mxu0 }
  0xb3   :  { %v341_v48 = vadd.f32 %v340_v47, %v130_v44  ;;  %v354_v49 = vpop.f32.mrf.mxu3  ;;  %v1325_v51 = vmin.f32 %v367_v46, 16.0  ;;  %v315_v52 = vadd.f32 %v314_v50, %v129_v39  ;;  %v328_v54 = vpop.f32.mrf.mxu1 }
  0xb5   :  { %v1327_v53 = vadd.f32 %v354_v49, %v341_v48  ;;  %v369_v55 = vmul.f32 2.1237322e-06, %v1325_v51  ;;  %v380_v56 = vmul.f32 3.8918573e-05, %v1325_v51  ;;  %v1331_v57 = vadd.f32 %v328_v54, %v315_v52 }
  0xb7   :  { %v1334_v58 = vmul.f32 0.70710677, %v1327_v53  ;;  %v370_v59 = vadd.f32 0.00028619796, %v369_v55  ;;  %v381_v60 = vadd.f32 0.001143296, %v380_v56 }
  0xb8   :  { %v1339_v62 = vmul.f32 0.70710677, %v1331_v57 }
  0xb9   :  { %v407_v61 = vmul.f32 %v1334_v58, %v1334_v58  ;;  %v371_v63 = vmul.f32 %v370_v59, %v1325_v51  ;;  %v382_v0 = vmul.f32 %v381_v60, %v1325_v51 }
  0xba   :  { %v342_v1 = vpop.f32.mrf.mxu2  ;;  %v447_v3 = vmul.f32 %v1339_v62, %v1339_v62 }
  0xbb   :  { %v1343_v2 = vmin.f32 %v407_v61, 16.0  ;;  %v343_v4 = vadd.f32 %v342_v1, %v130_v44  ;;  %v372_v5 = vadd.f32 0.0036580483, %v371_v63  ;;  %v383_v6 = vadd.f32 0.014752088, %v382_v0  ;;  %v356_v10 = vpop.f32.mrf.mxu3 }
  0xbc   :  { %v1349_v9 = vmin.f32 %v447_v3, 16.0 }
  0xbd   :  { %v409_v7 = vmul.f32 2.1237322e-06, %v1343_v2  ;;  %v420_v8 = vmul.f32 3.8918573e-05, %v1343_v2  ;;  %v373_v11 = vmul.f32 %v372_v5, %v1325_v51  ;;  %v384_v12 = vmul.f32 %v383_v6, %v1325_v51 }
  0xbe   :  { %v1353_v13 = vadd.f32 %v356_v10, %v343_v4  ;;  %v449_v16 = vmul.f32 2.1237322e-06, %v1349_v9  ;;  %v460_v18 = vmul.f32 3.8918573e-05, %v1349_v9 }
  0xbf   :  { %v410_v14 = vadd.f32 0.00028619796, %v409_v7  ;;  %v421_v15 = vadd.f32 0.001143296, %v420_v8  ;;  %v385_v17 = vadd.f32 0.112945676, %v384_v12 }
  0xc0   :  { %v374_v21 = vadd.f32 0.05243302, %v373_v11  ;;  %v461_v23 = vadd.f32 0.001143296, %v460_v18  ;;  %v1361_v24 = vmul.f32 0.70710677, %v1353_v13 }
  0xc1   :  { %v411_v19 = vmul.f32 %v410_v14, %v1343_v2  ;;  %v422_v20 = vmul.f32 %v421_v15, %v1343_v2  ;;  %v386_v22 = vmul.f32 %v385_v17, %v1325_v51  ;;  %v450_v26 = vadd.f32 0.00028619796, %v449_v16 }
  0xc2   :  { %v462_v29 = vmul.f32 %v461_v23, %v1349_v9  ;;  %v487_v30 = vmul.f32 %v1361_v24, %v1361_v24  ;;  %v375_v32 = vmul.f32 %v374_v21, %v1325_v51 }
  0xc3   :  { %v423_v25 = vadd.f32 0.014752088, %v422_v20  ;;  %v387_v27 = vadd.f32 0.4994258, %v386_v22  ;;  %v412_v28 = vadd.f32 0.0036580483, %v411_v19  ;;  %v451_v37 = vmul.f32 %v450_v26, %v1349_v9 }
  0xc4   :  { %v463_v34 = vadd.f32 0.014752088, %v462_v29  ;;  %v1369_v35 = vmin.f32 %v487_v30, 16.0  ;;  %v376_v42 = vadd.f32 0.18741608, %v375_v32 }
  0xc5   :  { %v424_v31 = vmul.f32 %v423_v25, %v1343_v2  ;;  %v388_v33 = vmul.f32 %v387_v27, %v1325_v51  ;;  %v413_v39 = vmul.f32 %v412_v28, %v1343_v2  ;;  %v452_v48 = vadd.f32 0.0036580483, %v451_v37 }
  0xc6   :  { %v464_v40 = vmul.f32 %v463_v34, %v1349_v9  ;;  %v489_v44 = vmul.f32 2.1237322e-06, %v1369_v35  ;;  %v500_v46 = vmul.f32 3.8918573e-05, %v1369_v35  ;;  %v377_v54 = vmul.f32 %v376_v42, %v1325_v51 }
  0xc7   :  { %v425_v36 = vadd.f32 0.112945676, %v424_v31  ;;  %v389_v38 = vadd.f32 1.0, %v388_v33  ;;  %v414_v49 = vadd.f32 0.05243302, %v413_v39  ;;  %v453_v61 = vmul.f32 %v452_v48, %v1349_v9 }
  0xc8   :  { %v465_v50 = vadd.f32 0.112945676, %v464_v40  ;;  %v490_v56 = vadd.f32 0.00028619796, %v489_v44  ;;  %v501_v59 = vadd.f32 0.001143296, %v500_v46 }
  0xc9   :  { %v426_v41 = vmul.f32 %v425_v36, %v1343_v2  ;;  %1186 = vrcp.f32 %v389_v38  ;;  %v415_v0 = vmul.f32 %v414_v49, %v1343_v2  ;;  %v378_v5 = vadd.f32 1.1283791, %v377_v54 }
  0xca   :  { %v466_v55 = vmul.f32 %v465_v50, %v1349_v9  ;;  %v502_v3 = vmul.f32 %v501_v59, %v1369_v35  ;;  %v491_v6 = vmul.f32 %v490_v56, %v1369_v35  ;;  %v454_v51 = vadd.f32 0.05243302, %v453_v61 }
  0xcb   :  { %v427_v47 = vadd.f32 0.4994258, %v426_v41  ;;  %v399_v11 = vand.u32 2147483647, %v389_v38  ;;  %v401_v12 = vand.u32 2147483648, %v389_v38  ;;  %vm395_vm1 = vweird.f32 %v389_v38 }
  0xcc   :  { %v467_v1 = vadd.f32 0.4994258, %v466_v55  ;;  %v503_v10 = vadd.f32 0.014752088, %v502_v3  ;;  %v416_v14 = vadd.f32 0.18741608, %v415_v0  ;;  %v379_v21 = vmul.f32 %v378_v5, %v1321_v45 }
  0xcd   :  { %v428_v52 = vmul.f32 %v427_v47, %v1343_v2  ;;  %v492_v18 = vadd.f32 0.0036580483, %v491_v6  ;;  %v402_v22 = vor.u32 1.1754944e-38, %v401_v12  ;;  %vm400_vm3 = vcmp.eq.f32.partialorder %v399_v11, 8.507059e+37 }
  0xce   :  { %v468_v8 = vmul.f32 %v467_v1, %v1349_v9  ;;  %v504_v17 = vmul.f32 %v503_v10, %v1369_v35  ;;  %v417_v23 = vmul.f32 %v416_v14, %v1343_v2  ;;  %v455_v27 = vmul.f32 %v454_v51, %v1349_v9 }
  0xcf   :  { %v429_v60 = vadd.f32 1.0, %v428_v52  ;;  %v1187_v63 = vpop.eup %1186  ;;  %v493_v31 = vmul.f32 %v492_v18, %v1369_v35  ;;  %v359_v3 = vmul.f32 0.5, %v1318_v43 }
  0xd0   :  { %v391_v4 = vmul.f32 %v1187_v63, %v389_v38  ;;  %vm396_vm0 = vweird.f32 %v1187_v63  ;;  %v1385_v16 = vadd.f32 1.0, %v468_v8  ;;  %v505_v28 = vadd.f32 0.112945676, %v504_v17 }
  0xd1   :  { %1188 = vrcp.f32 %v429_v60  ;;  %vm397_vm2 = vmor %vm395_vm1, %vm396_vm0  ;;  %v441_v33 = vand.u32 2147483648, %v429_v60  ;;  %v418_v36 = vadd.f32 1.1283791, %v417_v23  ;;  %v439_v37 = vand.u32 2147483647, %v429_v60 }
  0xd2   :  { %v392_v7 = vsub.f32 1.0, %v391_v4  ;;  %1190 = vrcp.f32 %v1385_v16  ;;  %v506_v34 = vmul.f32 %v505_v28, %v1369_v35  ;;  %v456_v2 = vadd.f32 0.18741608, %v455_v27 }
  0xd3   :  { %vm435_vm5 = vweird.f32 %v429_v60  ;;  %v494_v42 = vadd.f32 0.05243302, %v493_v31  ;;  %v442_v44 = vor.u32 1.1754944e-38, %v441_v33  ;;  %v419_v48 = vmul.f32 %v418_v36, %v1334_v58 }
  0xd4   :  { %v393_v15 = vmul.f32 %v1187_v63, %v392_v7  ;;  %v507_v39 = vadd.f32 0.4994258, %v506_v34  ;;  %vm440_vm7 = vcmp.eq.f32.partialorder %v439_v37, 8.507059e+37  ;;  %v457_v54 = vmul.f32 %v456_v2, %v1349_v9 }
  0xd5   :  { %v481_v61 = vand.u32 2147483648, %v1385_v16  ;;  %vm475_vm9 = vweird.f32 %v1385_v16  ;;  %v479_v58 = vand.u32 2147483647, %v1385_v16  ;;  %v360_v9 = vmul.f32 0.5, %v1327_v53 }
  0xd6   :  { %v394_v20 = vadd.f32 %v1187_v63, %v393_v15  ;;  %v508_v46 = vmul.f32 %v507_v39, %v1369_v35  ;;  %v458_v4 = vadd.f32 1.1283791, %v457_v54  ;;  %v362_v36 = vmul.f32 0.5, %v1353_v13 }
  0xd7   :  { %v1189_v19 = vpop.eup %1188  ;;  %v482_v51 = vor.u32 1.1754944e-38, %v481_v61  ;;  %vm480_vm11 = vcmp.eq.f32.partialorder %v479_v58, 8.507059e+37  ;;  %v1037_v61 = vld [vmem:[#allocation4 + $0x60] sm:$0xf] }
  0xd8   :  { %v431_v25 = vmul.f32 %v1189_v19, %v429_v60  ;;  %v398_v26 = vsel %vm397_vm2, %v1187_v63, %v394_v20  ;;  %vm436_vm4 = vweird.f32 %v1189_v19  ;;  %v1191_v38 = vpop.eup %1190  ;;  %v509_v55 = vadd.f32 1.0, %v508_v46  ;;  %v1109_v46 = vld [vmem:[#allocation4 + $0xf0] sm:$0xf] }
  0xd9   :  { %v403_v29 = vsel %vm400_vm3, %v402_v22, %v398_v26  ;;  %v471_v41 = vmul.f32 %v1191_v38, %v1385_v16  ;;  %vm437_vm6 = vmor %vm435_vm5, %vm436_vm4  ;;  %vm476_vm8 = vweird.f32 %v1191_v38  ;;  %v495_v60 = vmul.f32 %v494_v42, %v1369_v35  ;;  %v1045_v42 = vld [vmem:[#allocation4 + $0x70] sm:$0xf] }
  0xda   :  { %v432_v30 = vsub.f32 1.0, %v431_v25  ;;  %v404_v32 = vmul.f32 %v403_v29, %v379_v21  ;;  %1192 = vrcp.f32 %v509_v55  ;;  %vm477_vm10 = vmor %vm475_vm9, %vm476_vm8  ;;  %v459_v14 = vmul.f32 %v458_v4, %v1339_v62 }
  0xdb   :  { %v472_v50 = vsub.f32 1.0, %v471_v41  ;;  %v496_v6 = vadd.f32 0.18741608, %v495_v60  ;;  %v521_v20 = vand.u32 2147483648, %v509_v55  ;;  %v519_v62 = vand.u32 2147483647, %v509_v55 }
  0xdc   :  { %v433_v45 = vmul.f32 %v1189_v19, %v432_v30  ;;  %v983_v47 = vclamps-f32 %v404_v32, 1.0  ;;  %vm515_vm13 = vweird.f32 %v509_v55  ;;  %v361_v32 = vmul.f32 0.5, %v1331_v57 }
  0xdd   :  { %v473_v59 = vmul.f32 %v1191_v38, %v472_v50  ;;  %v497_v15 = vmul.f32 %v496_v6, %v1369_v35  ;;  %v522_v26 = vor.u32 1.1754944e-38, %v521_v20  ;;  %vm520_vm15 = vcmp.eq.f32.partialorder %v519_v62, 8.507059e+37  ;;  %v1047_v50 = vld [vmem:[#allocation4 + $0x78] sm:$0xf0] }
  0xde   :  { %v434_v40 = vadd.f32 %v1189_v19, %v433_v45  ;;  %v527_v63 = vadd.f32 1.0, %v983_v47  ;;  %v1256_v57 = vmov 256.0  }
  0xdf   :  { %v474_v0 = vadd.f32 %v1191_v38, %v473_v59  ;;  %v498_v22 = vadd.f32 1.1283791, %v497_v15  ;;  %1194 = vrcp.f32 %v1256_v57  ;;  %v1111_v59 = vld [vmem:[#allocation4 + $0xf8] sm:$0xf0]  ;;  %v1093_v15 = vld [vmem:[#allocation4 + $0xd0] sm:$0xf] }
  0xe0   :  { %v438_v49 = vsel %vm437_vm6, %v1189_v19, %v434_v40  ;;  %v1404_v8 = vmul.f32 %v527_v63, %v359_v3  ;;  %v1193_v11 = vpop.eup %1192  ;;  %v1160_v63 = vld [vmem:[#allocation4 + $0x64] sm:$0xf0]  ;;  %v1159_v3 = vld [vmem:[#allocation4 + $0x64] sm:$0xf]  ;;  %v1013_v57 = vld [vmem:[#allocation4 + $0x30] sm:$0xf] }
  0xe1   :  { %v443_v52 = vsel %vm440_vm7, %v442_v44, %v438_v49  ;;  %v478_v5 = vsel %vm477_vm10, %v1191_v38, %v474_v0  ;;  %v511_v43 = vmul.f32 %v1193_v11, %v509_v55  ;;  %vm516_vm12 = vweird.f32 %v1193_v11  ;;  %v1162_v44 = vld [vmem:[#allocation4 + $0x74] sm:$0xf0]  ;;  %v1161_v49 = vld [vmem:[#allocation4 + $0x74] sm:$0xf]  ;;  %v1101_v0 = vld [vmem:[#allocation4 + $0xe0] sm:$0xf] }
  0xe2   :  { %v444_v56 = vmul.f32 %v443_v52, %v419_v48  ;;  %v483_v12 = vsel %vm480_vm11, %v482_v51, %v478_v5  ;;  %v550_v16 = vmul.f32 %v1404_v8, %v1404_v8  ;;  %vm517_vm14 = vmor %vm515_vm13, %vm516_vm12  ;;  %v499_v27 = vmul.f32 %v498_v22, %v1361_v24  ;;  %v1178_v48 = vld [vmem:[#allocation4 + $0xf4] sm:$0xf0]  ;;  %v1103_v51 = vld [vmem:[#allocation4 + $0xe8] sm:$0xf0] }
  0xe3   :  { %v484_v18 = vmul.f32 %v483_v12, %v459_v14  ;;  %v512_v19 = vsub.f32 1.0, %v511_v43  ;;  %v1046_v47 = vor.u32 %v1162_v44, %v1045_v42  ;;  %v1110_v54 = vor.u32 %v1178_v48, %v1109_v46  ;;  %v1029_v12 = vld [vmem:[#allocation4 + $0x50] sm:$0xf]  ;;  %v1158_v14 = vld [vmem:[#allocation4 + $0x54] sm:$0xf0] }
  0xe4   :  { %v984_v1 = vclamps-f32 %v444_v56, 1.0  ;;  %v1050_v55 = vor.u32 %v1161_v49, %v1047_v50  ;;  %v1177_v56 = vld [vmem:[#allocation4 + $0xf4] sm:$0xf]  ;;  %v1038_v58 = vor.u32 %v1160_v63, %v1037_v61  ;;  %v1030_v43 = vor.u32 %v1158_v14, %v1029_v12  ;;  %v1095_v22 = vld [vmem:[#allocation4 + $0xd8] sm:$0xf0] }
  0xe5   :  { %v513_v23 = vmul.f32 %v1193_v11, %v512_v19  ;;  %v985_v35 = vclamps-f32 %v484_v18, 1.0  ;;  %v1195_v40 = vpop.eup %1194  ;;  %781 = vmatpush.bf16.msrb.mxu0 %v1046_v47  ;;  %v1114_v60 = vor.u32 %v1177_v56, %v1111_v59  ;;  %795 = vmatpush.bf16.msrb.mxu1 %v1110_v54  ;;  %v1170_v42 = vld [vmem:[#allocation4 + $0xb4] sm:$0xf0]  ;;  %v1153_v44 = vld [vmem:[#allocation4 + $0x34] sm:$0xf] }
  0xe6   :  { %v528_v7 = vadd.f32 1.0, %v984_v1  ;;  %v542_v41 = vmul.f32 256.0, %v1195_v40  ;;  %809 = vmatpush.bf16.msrb.mxu2 %v1050_v55  ;;  %v1176_v1 = vld [vmem:[#allocation4 + $0xe4] sm:$0xf0]  ;;  %vm546_vm0 = vweird.f32 %v1195_v40  ;;  %v1015_v46 = vld [vmem:[#allocation4 + $0x38] sm:$0xf0] }
  0xe7   :  { %v514_v25 = vadd.f32 %v1193_v11, %v513_v23  ;;  %v529_v30 = vadd.f32 1.0, %v985_v35  ;;  %823 = vmatpush.bf16.msrb.mxu3 %v1114_v60  ;;  %v1102_v5 = vor.u32 %v1176_v1, %v1101_v0  ;;  %v1021_v35 = vld [vmem:[#allocation4 + $0x40] sm:$0xf]  ;;  %v1018_v49 = vor.u32 %v1153_v44, %v1015_v46  ;;  %v1169_v50 = vld [vmem:[#allocation4 + $0xb4] sm:$0xf] }
  0xe8   :  { %v1406_v10 = vmul.f32 %v528_v7, %v360_v9  ;;  %v543_v13 = vsub.f32 1.0, %v542_v41  ;;  %v1039_v9 = vld [vmem:[#allocation4 + $0x68] sm:$0xf0]  ;;  %v1175_v7 = vld [vmem:[#allocation4 + $0xe4] sm:$0xf] }
  0xe9   :  { %v518_v28 = vsel %vm517_vm14, %v1193_v11, %v514_v25  ;;  %v1418_v34 = vmul.f32 %v529_v30, %v361_v32  ;;  %v1042_v6 = vor.u32 %v1159_v3, %v1039_v9  ;;  %782 = vmatpush.bf16.msrb.mxu0 %v1038_v58  ;;  %v1106_v11 = vor.u32 %v1175_v7, %v1103_v51  ;;  %v1156_v25 = vld [vmem:[#allocation4 + $0x44] sm:$0xf0]  ;;  %v1155_v30 = vld [vmem:[#allocation4 + $0x44] sm:$0xf]  ;;  %v1077_v41 = vld [vmem:[#allocation4 + $0xb0] sm:$0xf] }
  0xea   :  { %v535_v53 = vadd.f32 %v1406_v10, %v1404_v8  ;;  %v551_v17 = vmul.f32 %v1406_v10, %v1406_v10  ;;  %v523_v29 = vsel %vm520_vm15, %v522_v26, %v518_v28  ;;  %v544_v52 = vmul.f32 %v1195_v40, %v543_v13  ;;  %796 = vmatpush.bf16.msrb.mxu1 %v1102_v5  ;;  %v1085_v26 = vld [vmem:[#allocation4 + $0xc0] sm:$0xf]  ;;  %v1152_v59 = vld [vmem:[#allocation4 + $0x24] sm:$0xf0]  ;;  %v1151_v0 = vld [vmem:[#allocation4 + $0x24] sm:$0xf] }
  0xeb   :  { %v524_v31 = vmul.f32 %v523_v29, %v499_v27  ;;  %v552_v24 = vmul.f32 %v1418_v34, %v1418_v34  ;;  %810 = vmatpush.bf16.msrb.mxu2 %v1042_v6  ;;  %824 = vmatpush.bf16.msrb.mxu3 %v1106_v11  ;;  %v1022_v28 = vor.u32 %v1156_v25, %v1021_v35  ;;  %v1172_v29 = vld [vmem:[#allocation4 + $0xc4] sm:$0xf0]  ;;  %v1005_v56 = vld [vmem:[#allocation4 + $0x20] sm:$0xf]  ;;  %v1007_v1 = vld [vmem:[#allocation4 + $0x28] sm:$0xf0] }
  0xec   :  { %536 = vadd.xlane.f32.xlu0 %v535_v53  ;;  %v554_v21 = vadd.f32 %v551_v17, %v550_v16  ;;  %v545_v4 = vadd.f32 %v1195_v40, %v544_v52  ;;  %v1174_v53 = vld [vmem:[#allocation4 + $0xd4] sm:$0xf0]  ;;  %v1157_v16 = vld [vmem:[#allocation4 + $0x54] sm:$0xf]  ;;  %v1031_v17 = vld [vmem:[#allocation4 + $0x58] sm:$0xf0]  ;;  %v1086_v32 = vor.u32 %v1172_v29, %v1085_v26  ;;  %v1078_v48 = vor.u32 %v1170_v42, %v1077_v41 }
  0xed   :  { %v986_v33 = vclamps-f32 %v524_v31, 1.0  ;;  %v1094_v19 = vor.u32 %v1174_v53, %v1093_v15  ;;  %v1034_v20 = vor.u32 %v1157_v16, %v1031_v17  ;;  %783 = vmatpush.bf16.msrb.mxu0 %v1030_v43  ;;  %v1023_v31 = vld [vmem:[#allocation4 + $0x48] sm:$0xf0]  ;;  %v1079_v52 = vld [vmem:[#allocation4 + $0xb8] sm:$0xf0]  ;;  %v1006_v60 = vor.u32 %v1152_v59, %v1005_v56 }
  0xee   :  { %555 = vadd.xlane.f32.xlu1 %v554_v21  ;;  %v1429_v18 = vsel %vm546_vm0, %v1195_v40, %v545_v4  ;;  %v1173_v21 = vld [vmem:[#allocation4 + $0xd4] sm:$0xf]  ;;  %v1154_v40 = vld [vmem:[#allocation4 + $0x34] sm:$0xf0]  ;;  %v1082_v54 = vor.u32 %v1169_v50, %v1079_v52  ;;  %v1069_v61 = vld [vmem:[#allocation4 + $0xa0] sm:$0xf]  ;;  %v1010_v4 = vor.u32 %v1151_v0, %v1007_v1 }
  0xef   :  { %v530_v45 = vadd.f32 1.0, %v986_v33  ;;  %v1098_v23 = vor.u32 %v1173_v21, %v1095_v22  ;;  %797 = vmatpush.bf16.msrb.mxu1 %v1094_v19  ;;  %811 = vmatpush.bf16.msrb.mxu2 %v1034_v20  ;;  %v1026_v33 = vor.u32 %v1155_v30, %v1023_v31  ;;  %v1014_v13 = vor.u32 %v1154_v40, %v1013_v57  ;;  %v1168_v63 = vld [vmem:[#allocation4 + $0xa4] sm:$0xf0]  ;;  %v1167_v3 = vld [vmem:[#allocation4 + $0xa4] sm:$0xf] }
  0xf0   :  { %v1070_v58 = vor.u32 %v1168_v63, %v1069_v61  ;;  %v1071_v9 = vld [vmem:[#allocation4 + $0xa8] sm:$0xf0]  ;;  %v997_v6 = vld [vmem:[#allocation4 + $0x10] sm:$0xf]  ;;  %v1150_v7 = vld [vmem:[#allocation4 + $0x14] sm:$0xf0] }
  0xf1   :  { %v1421_v37 = vmul.f32 %v530_v45, %v362_v36  ;;  %825 = vmatpush.bf16.msrb.mxu3 %v1098_v23  ;;  %v1171_v36 = vld [vmem:[#allocation4 + $0xc4] sm:$0xf]  ;;  %v1087_v45 = vld [vmem:[#allocation4 + $0xc8] sm:$0xf0]  ;;  %784 = vmatpush.bf16.msrb.mxu0 %v1022_v28  ;;  %v1074_v5 = vor.u32 %v1167_v3, %v1071_v9  ;;  %v1061_v51 = vld [vmem:[#allocation4 + $0x90] sm:$0xf]  ;;  %v998_v11 = vor.u32 %v1150_v7, %v997_v6 }
  0xf2   :  { %v1166_v12 = vld [vmem:[#allocation4 + $0x94] sm:$0xf0]  ;;  %v1149_v14 = vld [vmem:[#allocation4 + $0x14] sm:$0xf]  ;;  %v999_v15 = vld [vmem:[#allocation4 + $0x18] sm:$0xf0] }
  0xf3   :  { %v538_v38 = vadd.f32 %v1421_v37, %v1418_v34  ;;  %v553_v2 = vmul.f32 %v1421_v37, %v1421_v37  ;;  %798 = vmatpush.bf16.msrb.mxu1 %v1086_v32  ;;  %812 = vmatpush.bf16.msrb.mxu2 %v1026_v33  ;;  %v1062_v43 = vor.u32 %v1166_v12, %v1061_v51  ;;  %v1165_v16 = vld [vmem:[#allocation4 + $0x94] sm:$0xf]  ;;  %v1063_v17 = vld [vmem:[#allocation4 + $0x98] sm:$0xf0]  ;;  %v989_v19 = vld [vmem:[#allocation4] sm:$0xf] }
  0xf4   :  { %v1002_v53 = vor.u32 %v1149_v14, %v999_v15  ;;  %v1066_v20 = vor.u32 %v1165_v16, %v1063_v17  ;;  %v1148_v21 = vld [vmem:[#allocation4 + $0x4] sm:$0xf0]  ;;  %v1053_v22 = vld [vmem:[#allocation4 + $0x80] sm:$0xf]  ;;  %v1147_v26 = vld [vmem:[#allocation4 + $0x4] sm:$0xf] }
  0xf5   :  { %539 = vadd.xlane.f32.xlu0 %v538_v38  ;;  %v557_v39 = vadd.f32 %v553_v2, %v552_v24  ;;  %v1090_v2 = vor.u32 %v1171_v36, %v1087_v45  ;;  %785 = vmatpush.bf16.msrb.mxu0 %v1014_v13  ;;  %v1164_v23 = vld [vmem:[#allocation4 + $0x84] sm:$0xf0]  ;;  %v990_v35 = vor.u32 %v1148_v21, %v989_v19  ;;  %v991_v28 = vld [vmem:[#allocation4 + $0x8] sm:$0xf0]  ;;  %v1163_v29 = vld [vmem:[#allocation4 + $0x84] sm:$0xf] }
  0xf6   :  { %v1054_v25 = vor.u32 %v1164_v23, %v1053_v22  ;;  %v994_v30 = vor.u32 %v1147_v26, %v991_v28  ;;  %v1055_v31 = vld [vmem:[#allocation4 + $0x88] sm:$0xf0] }
  0xf7   :  { %558 = vadd.xlane.f32.xlu1 %v557_v39  ;;  %826 = vmatpush.bf16.msrb.mxu3 %v1090_v2  ;;  %v1058_v33 = vor.u32 %v1163_v29, %v1055_v31 }
  0xf8   :  { %799 = vmatpush.bf16.msrb.mxu1 %v1078_v48  ;;  %813 = vmatpush.bf16.msrb.mxu2 %v1018_v49 }
  0xf9   :  { %786 = vmatpush.bf16.msrb.mxu0 %v1006_v60 }
  0xfb   :  { %827 = vmatpush.bf16.msrb.mxu3 %v1082_v54 }
  0xfc   :  { %800 = vmatpush.bf16.msrb.mxu1 %v1070_v58  ;;  %814 = vmatpush.bf16.msrb.mxu2 %v1010_v4 }
  0xfd   :  { %787 = vmatpush.bf16.msrb.mxu0 %v998_v11 }
  0xff   :  { %828 = vmatpush.bf16.msrb.mxu3 %v1074_v5 }
 0x100   :  { %801 = vmatpush.bf16.msrb.mxu1 %v1062_v43  ;;  %815 = vmatpush.bf16.msrb.mxu2 %v1002_v53 }
 0x101   :  { %788 = vmatpush.bf16.msrb.mxu0 %v990_v35 }
 0x103   :  { %829 = vmatpush.bf16.msrb.mxu3 %v1066_v20 }
 0x104   :  { %802 = vmatpush.bf16.msrb.mxu1 %v1054_v25  ;;  %816 = vmatpush.bf16.msrb.mxu2 %v994_v30 }
 0x107   :  { %830 = vmatpush.bf16.msrb.mxu3 %v1058_v33 }
 0x15f   :  { %v537_v62 = vpop.xlane.xlu0 %536 }
 0x160   :  { %v1432_v27 = vmul.f32 %v1429_v18, %v537_v62 }
 0x161   :  { %v556_v38 = vpop.xlane.xlu1 %555 }
 0x162   :  { %v562_v24 = vmul.f32 %v1432_v27, %v1432_v27  ;;  %v560_v39 = vmul.f32 %v556_v38, %v1429_v18  ;;  %v566_v50 = vsub.f32 %v1404_v8, %v1432_v27  ;;  %v567_v52 = vsub.f32 %v1406_v10, %v1432_v27 }
 0x164   :  { %v564_v47 = vsub.f32 %v560_v39, %v562_v24 }
 0x166   :  { %v1437_v55 = vadd.f32 1e-05, %v564_v47 }
 0x168   :  { %1196 = vrsqrt.f32 %v1437_v55  ;;  %v540_v32 = vpop.xlane.xlu0 %539  ;;  %vm578_vm2 = vweird.f32 %v1437_v55 }
 0x169   :  { %v549_v45 = vmul.f32 %v1429_v18, %v540_v32 }
 0x16a   :  { %v559_v38 = vpop.xlane.xlu1 %558 }
 0x16b   :  { %v561_v24 = vmul.f32 %v559_v38, %v1429_v18  ;;  %v563_v2 = vmul.f32 %v549_v45, %v549_v45  ;;  %v123_v18 = vld [vmem:[%s1474_s3] sm:$0x3]  ;;  %v568_v0 = vsub.f32 %v1418_v34, %v549_v45  ;;  %v569_v58 = vsub.f32 %v1421_v37, %v549_v45 }
 0x16c   :  { %v597_v59 = vperm.slane %v123_v18, 0  ;;  %v598_v61 = vperm.slane %v123_v18, 1  ;;  %v125_v34 = vld [vmem:[%s1477_s6] sm:$0x3] }
 0x16d   :  { %v565_v57 = vsub.f32 %v561_v24, %v563_v2  ;;  %v617_v37 = vperm.slane %v125_v34, 0  ;;  %v618_v19 = vperm.slane %v125_v34, 1 }
 0x16e   :  { %v1197_v62 = vpop.eup %1196 }
 0x16f   :  { %v573_v36 = vmul.f32 %v1197_v62, %v1437_v55  ;;  %v571_v40 = vadd.f32 1e-05, %v565_v57  ;;  %vm579_vm1 = vweird.f32 %v1197_v62  ;;  %v124_v55 = vld [vmem:[%s1475_s4] sm:$0x3] }
 0x170   :  { %vm580_vm3 = vmor %vm578_vm2, %vm579_vm1  ;;  %v606_v1 = vperm.slane %v124_v55, 0  ;;  %v607_v10 = vperm.slane %v124_v55, 1 }
 0x171   :  { %v574_v39 = vmul.f32 %v1197_v62, %v573_v36  ;;  %1198 = vrsqrt.f32 %v571_v40  ;;  %vm588_vm5 = vweird.f32 %v571_v40 }
 0x173   :  { %v575_v41 = vmul.f32 0.5, %v574_v39 }
 0x175   :  { %v576_v13 = vsub.f32 1.5, %v575_v41 }
 0x177   :  { %v1199_v42 = vpop.eup %1198  ;;  %v577_v44 = vmul.f32 %v1197_v62, %v576_v13 }
 0x178   :  { %v583_v46 = vmul.f32 %v1199_v42, %v571_v40  ;;  %vm589_vm4 = vweird.f32 %v1199_v42 }
 0x179   :  { %v581_v48 = vsel %vm580_vm3, %v1197_v62, %v577_v44  ;;  %vm590_vm6 = vmor %vm588_vm5, %vm589_vm4 }
 0x17a   :  { %v584_v47 = vmul.f32 %v1199_v42, %v583_v46  ;;  %v592_v56 = vmul.f32 %v581_v48, %v566_v50  ;;  %v593_v60 = vmul.f32 %v581_v48, %v567_v52 }
 0x17c   :  { %v585_v49 = vmul.f32 0.5, %v584_v47  ;;  %v601_v3 = vmul.f32 %v597_v59, %v592_v56  ;;  %v602_v4 = vmul.f32 %v598_v61, %v593_v60 }
 0x17e   :  { %v586_v54 = vsub.f32 1.5, %v585_v49  ;;  %v610_v7 = vadd.f32 %v606_v1, %v601_v3  ;;  %v611_v11 = vadd.f32 %v607_v10, %v602_v4 }
 0x180   :  { %v587_v63 = vmul.f32 %v1199_v42, %v586_v54 }
 0x182   :  { %v591_v8 = vsel %vm590_vm6, %v1199_v42, %v587_v63 }
 0x183   :  { %v594_v27 = vmul.f32 %v591_v8, %v568_v0  ;;  %v595_v9 = vmul.f32 %v591_v8, %v569_v58 }
 0x185   :  { %v603_v5 = vmul.f32 %v597_v59, %v594_v27  ;;  %v604_v6 = vmul.f32 %v598_v61, %v595_v9 }
 0x187   :  { %v612_v51 = vadd.f32 %v606_v1, %v603_v5  ;;  %v613_v12 = vadd.f32 %v607_v10, %v604_v6 }
 0x189   :  { %v614_v14 = vpack.c.bf16 %v612_v51, %v610_v7  ;;  %v615_v15 = vpack.c.bf16 %v613_v12, %v611_v11 }
 0x18b   :  { %789 = vmatmul.bf16.vlgmr.msrb.gmra.mxu0 %v614_v14  ;;  %803 = vmatmul.bf16.vlgmr.msrb.gmra.mxu1 %v615_v15 }
 0x18c   :  { %817 = vmatmul.bf16.vlgmr.msrb.gmra.mxu2 %v614_v14  ;;  %831 = vmatmul.bf16.vlgmr.msrb.gmra.mxu3 %v615_v15 }
 0x208   :  { %v790_v43 = vpop.f32.mrf.mxu0  ;;  %v804_v53 = vpop.f32.mrf.mxu1 }
 0x209   :  { %v791_v16 = vadd.f32 %v790_v43, %v617_v37 }
 0x20b   :  { %v805_v17 = vadd.f32 %v804_v53, %v791_v16 }
 0x20d   :  { %837 = vst [vmem:[%s1478_s7] sm:$0xff] %v805_v17 }
 0x20f   :  { %v818_v20 = vpop.f32.mrf.mxu2  ;;  %v832_v21 = vpop.f32.mrf.mxu3 }
 0x210   :  { %v819_v22 = vadd.f32 %v818_v20, %v618_v19  ;;  %v792_v23 = vpop.f32.mrf.mxu0  ;;  %v806_v25 = vpop.f32.mrf.mxu1 }
 0x211   :  { %v793_v62 = vadd.f32 %v792_v23, %v617_v37 }
 0x212   :  { %v833_v35 = vadd.f32 %v832_v21, %v819_v22 }
 0x213   :  { %v807_v26 = vadd.f32 %v806_v25, %v793_v62 }
 0x214   :  { %838 = vst [vmem:[%s1478_s7 + $0x8] sm:$0xff] %v833_v35 }
 0x215   :  { %839 = vst [vmem:[%s1478_s7 + $0x10] sm:$0xff] %v807_v26 }
 0x217   :  { %v820_v28 = vpop.f32.mrf.mxu2  ;;  %v834_v30 = vpop.f32.mrf.mxu3 }
 0x218   :  { %v821_v29 = vadd.f32 %v820_v28, %v618_v19 }
 0x21a   :  { %v835_v31 = vadd.f32 %v834_v30, %v821_v29 }
 0x21c   :  { %840 = vst [vmem:[%s1478_s7 + $0x18] sm:$0xff] %v835_v31 }
 0x21d   :  { %845 = vsyncpa [#allocation3], 1 }
 0x21e   :  { %846 = vsyncpa [#allocation5], 1 }

</bundles_post_ra>
